<compile_context>
chip_gen: v5e
topology: v5e:2x2
jax: 0.10.0
libtpu: 0.0.40
codegen_flags: <defaults>
</compile_context>

<pallas_src>
import functools
import math

import jax
import jax.numpy as jnp
from jax.experimental import pallas as pl
from jax.experimental.pallas import tpu as pltpu


def _round_up(x, m):
    return ((x + m - 1) // m) * m


def _cdiv(a, b):
    return -(-a // b)


# ---------------------------------------------------------------------------
# Kernels
# ---------------------------------------------------------------------------
def _cde_kernel_full(z_ref, w1_ref, b1_ref, w2_ref, b2_ref, w3_ref, b3_ref,
                     o_ref, *, act_dtype):
    """Fused MLP, full (padded) output width per row tile (1-D grid)."""
    h1 = jnp.dot(z_ref[...], w1_ref[...], preferred_element_type=jnp.float32)
    h1 = jnp.maximum(h1 + b1_ref[...], 0.0)                       # ReLU
    h2 = jnp.dot(h1.astype(w2_ref.dtype), w2_ref[...],
                 preferred_element_type=jnp.float32)
    h2 = jnp.maximum(h2 + b2_ref[...], 0.0)                       # ReLU
    h3 = jnp.dot(h2.astype(w3_ref.dtype), w3_ref[...],
                 preferred_element_type=jnp.float32)
    # bf16 path: tanh runs in bf16 (EUP bf16 on v6e/v7x); f32 otherwise.
    pre = (h3 + b3_ref[...]).astype(act_dtype)
    o_ref[...] = jnp.tanh(pre).astype(o_ref.dtype)                # Tanh


def _cde_kernel_tiled(z_ref, w1_ref, b1_ref, w2_ref, b2_ref, w3_ref, b3_ref,
                      o_ref, h2_ref, *, act_dtype):
    """Fallback for very large out_dim: 2-D grid (rows, out-feature tiles).

    j is innermost and "arbitrary"; h2 is computed once per row tile (j == 0)
    into VMEM scratch and reused for every output-feature tile, so the first
    two matmuls are never recomputed.
    """
    @pl.when(pl.program_id(1) == 0)
    def _():
        h1 = jnp.dot(z_ref[...], w1_ref[...],
                     preferred_element_type=jnp.float32)
        h1 = jnp.maximum(h1 + b1_ref[...], 0.0)
        h2 = jnp.dot(h1.astype(w2_ref.dtype), w2_ref[...],
                     preferred_element_type=jnp.float32)
        h2_ref[...] = jnp.maximum(h2 + b2_ref[...], 0.0)

    h3 = jnp.dot(h2_ref[...].astype(w3_ref.dtype), w3_ref[...],
                 preferred_element_type=jnp.float32)
    pre = (h3 + b3_ref[...]).astype(act_dtype)
    o_ref[...] = jnp.tanh(pre).astype(o_ref.dtype)


# ---------------------------------------------------------------------------
# VMEM budgeting
# ---------------------------------------------------------------------------
def _vmem_cap_bytes():
    """Generation-aware VMEM budget with headroom for Mosaic internals."""
    try:
        cap = int(pltpu.get_tpu_info().vmem_capacity_bytes)
    except Exception:
        cap = 64 * 2**20            # conservative default (covers v7x)
    # ~80% of physical: ~51 MiB on v7x (64 MiB), ~100 MiB on v5e/v6e (128 MiB)
    return min(int(cap * 0.8), 100 * 2**20)


def _need_bytes(tb, hidden, bneck, n_cols, csz, osz, extra=0):
    weights = (hidden * bneck * csz + bneck * 4            # w1, b1
               + bneck * bneck * csz + bneck * 4           # w2, b2
               + bneck * n_cols * csz + n_cols * 4)        # w3, b3 (tile)
    io_tiles = tb * hidden * csz + tb * n_cols * osz       # z tile, out tile
    interm = tb * (2 * bneck + n_cols) * 4                 # h1, h2, h3 (f32)
    return 2 * (weights + io_tiles) + interm + extra


# ---------------------------------------------------------------------------
# Wrapper
# ---------------------------------------------------------------------------
def prepare_params(params, *, in_channels, hidden_channels,
                   compute_dtype=jnp.float32):
    """One-time weight prep (pad out_dim to a lane multiple + dtype cast).

    Hoisted out of the per-call path: a CDE vector field is evaluated every
    ODE solver step, so per-call pad/cast of w3 would add a w3-sized HBM copy
    per step. Weights are (in, out) so the kernel computes x @ W + b.
    """
    w1, b1, w2, b2, w3, b3 = params
    out_dim = in_channels * hidden_channels
    out_pad = _round_up(out_dim, 128)
    if out_pad != out_dim:
        w3 = jnp.pad(w3, ((0, 0), (0, out_pad - out_dim)))
        b3 = jnp.pad(b3, ((0, 0), (0, out_pad - out_dim)))
    return (w1.astype(compute_dtype), b1.astype(jnp.float32),
            w2.astype(compute_dtype), b2.astype(jnp.float32),
            w3.astype(compute_dtype), b3.astype(jnp.float32))


@functools.partial(
    jax.jit,
    static_argnames=("in_channels", "hidden_channels", "tb", "tn",
                     "compute_dtype", "force_tiled"))
def cde_func_forward(z, prepared_params, *, in_channels, hidden_channels,
                     tb=256, tn=2048, compute_dtype=jnp.float32,
                     force_tiled=False):
    """z: (..., hidden_channels) -> (..., hidden_channels, in_channels).

    compute_dtype=bf16 is worthwhile on all generations (v5e's MXU also takes
    bf16 at full rate); accumulation stays in f32.
    """
    w1c, b1f, w2c, b2f, w3c, b3f = prepared_params
    out_dtype = z.dtype
    lead = z.shape[:-1]
    B = math.prod(lead)

    bneck = w1c.shape[1]
    out_dim = in_channels * hidden_channels
    out_pad128 = w3c.shape[1]                       # padded at prep time

    csz = jnp.dtype(compute_dtype).itemsize
    osz = jnp.dtype(out_dtype).itemsize
    sub = 16 if csz < 4 else 8                      # dtype-dependent sublane
    act_dtype = jnp.bfloat16 if csz == 2 else jnp.float32

    # ---- Row (M) tiling: balanced tiles (no ballooning pad on awkward B);
    #      target >=2 row tiles when B allows so both v7x TCs get work.
    want_tiles = max(1, _cdiv(B, tb))
    if B >= 2 * sub:
        want_tiles = max(want_tiles, 2)
    tb_eff = _round_up(_cdiv(B, want_tiles), sub)
    B_pad = _round_up(B, tb_eff)
    grid_rows = B_pad // tb_eff

    z2 = z.reshape(B, hidden_channels)
    if B_pad != B:
        z2 = jnp.pad(z2, ((0, B_pad - B), (0, 0)))
    z2 = z2.astype(compute_dtype)

    cap = _vmem_cap_bytes()
    need_full = _need_bytes(tb_eff, hidden_channels, bneck, out_pad128,
                            csz, osz)
    use_full = (not force_tiled) and int(need_full * 1.25) <= cap

    if use_full:
        # ---- Fast path: 1-D grid over rows, full padded output width per
        #      step. No recomputation of layers 1/2, w3 streamed once per row.
        vmem_limit = int(min(cap, max(int(need_full * 1.25), 32 * 2**20)))
        out = pl.pallas_call(
            functools.partial(_cde_kernel_full, act_dtype=act_dtype),
            out_shape=jax.ShapeDtypeStruct((B_pad, out_pad128), out_dtype),
            grid_spec=pltpu.PrefetchScalarGridSpec(
                num_scalar_prefetch=0,
                grid=(grid_rows,),
                in_specs=[
                    pl.BlockSpec((tb_eff, hidden_channels), lambda i: (i, 0)),
                    pl.BlockSpec((hidden_channels, bneck), lambda i: (0, 0)),
                    pl.BlockSpec((1, bneck), lambda i: (0, 0)),
                    pl.BlockSpec((bneck, bneck), lambda i: (0, 0)),
                    pl.BlockSpec((1, bneck), lambda i: (0, 0)),
                    pl.BlockSpec((bneck, out_pad128), lambda i: (0, 0)),
                    pl.BlockSpec((1, out_pad128), lambda i: (0, 0)),
                ],
                out_specs=pl.BlockSpec((tb_eff, out_pad128),
                                       lambda i: (i, 0)),
            ),
            compiler_params=pltpu.CompilerParams(
                dimension_semantics=("parallel",),
                vmem_limit_bytes=vmem_limit),
        )(z2, w1c, b1f, w2c, b2f, w3c, b3f)
    else:
        # ---- Fallback for very large out_dim: tile the output-feature axis,
        #      cache h2 in VMEM scratch (computed once per row tile).
        tn_eff = _round_up(min(tn, out_pad128), 128)
        scratch = tb_eff * bneck * 4
        while (tn_eff > 128 and
               int(_need_bytes(tb_eff, hidden_channels, bneck, tn_eff,
                               csz, osz, extra=scratch) * 1.25) > cap):
            tn_eff = _round_up(tn_eff // 2, 128)
        out_pad = _round_up(out_pad128, tn_eff)
        if out_pad != out_pad128:
            # Rare extra per-call pad so tn_eff divides the padded width.
            w3c = jnp.pad(w3c, ((0, 0), (0, out_pad - out_pad128)))
            b3f = jnp.pad(b3f, ((0, 0), (0, out_pad - out_pad128)))
        need = _need_bytes(tb_eff, hidden_channels, bneck, tn_eff, csz, osz,
                           extra=scratch)
        vmem_limit = int(min(cap, max(int(need * 1.25), 32 * 2**20)))
        # TODO(synk): for very large bneck, single-buffer the grid-invariant
        # w1/w2 blocks (pipeline_mode=pl.Buffered(1)) to reclaim VMEM.
        out = pl.pallas_call(
            functools.partial(_cde_kernel_tiled, act_dtype=act_dtype),
            out_shape=jax.ShapeDtypeStruct((B_pad, out_pad), out_dtype),
            grid_spec=pltpu.PrefetchScalarGridSpec(
                num_scalar_prefetch=0,
                grid=(grid_rows, out_pad // tn_eff),
                in_specs=[
                    pl.BlockSpec((tb_eff, hidden_channels),
                                 lambda i, j: (i, 0)),
                    pl.BlockSpec((hidden_channels, bneck),
                                 lambda i, j: (0, 0)),
                    pl.BlockSpec((1, bneck), lambda i, j: (0, 0)),
                    pl.BlockSpec((bneck, bneck), lambda i, j: (0, 0)),
                    pl.BlockSpec((1, bneck), lambda i, j: (0, 0)),
                    pl.BlockSpec((bneck, tn_eff), lambda i, j: (0, j)),
                    pl.BlockSpec((1, tn_eff), lambda i, j: (0, j)),
                ],
                out_specs=pl.BlockSpec((tb_eff, tn_eff),
                                       lambda i, j: (i, j)),
                scratch_shapes=[pltpu.VMEM((tb_eff, bneck), jnp.float32)],
            ),
            compiler_params=pltpu.CompilerParams(
                dimension_semantics=("parallel", "arbitrary"),
                vmem_limit_bytes=vmem_limit),
        )(z2, w1c, b1f, w2c, b2f, w3c, b3f)

    out = out[:B, :out_dim]
    return out.reshape(*lead, hidden_channels, in_channels)


# ---------------------------------------------------------------------------
# Parameters & reference
# ---------------------------------------------------------------------------
def init_params(key, in_channels, hidden_channels, bottleneck_channels=128,
                dtype=jnp.float32):
    """Deterministic synthetic params. Weights stored as (in, out) so the
    kernel computes x @ W + b (equivalent to torch's x @ W.T + b)."""
    ks = jax.random.split(key, 6)

    def lin(kw, kb, fan_in, fan_out):
        bound = 1.0 / jnp.sqrt(fan_in)
        w = jax.random.uniform(kw, (fan_in, fan_out), dtype, -bound, bound)
        b = jax.random.uniform(kb, (1, fan_out), dtype, -bound, bound)
        return w, b

    w1, b1 = lin(ks[0], ks[1], hidden_channels, bottleneck_channels)
    w2, b2 = lin(ks[2], ks[3], bottleneck_channels, bottleneck_channels)
    w3, b3 = lin(ks[4], ks[5], bottleneck_channels,
                 in_channels * hidden_channels)
    return (w1, b1, w2, b2, w3, b3)


def reference_forward(z, params, in_channels, hidden_channels):
    w1, b1, w2, b2, w3, b3 = params
    h = jnp.maximum(z @ w1 + b1[0], 0.0)
    h = jnp.maximum(h @ w2 + b2[0], 0.0)
    o = jnp.tanh(h @ w3 + b3[0])
    return o.reshape(*z.shape[:-1], hidden_channels, in_channels)


if __name__ == "__main__":
    in_channels = 4
    hidden_channels = 32
    bottleneck_channels = 128
    batch, seq = 2, 8

    key = jax.random.PRNGKey(0)
    kz, kp = jax.random.split(key)
    z = jax.random.normal(kz, (batch, seq, hidden_channels), dtype=jnp.float32)
    params = init_params(kp, in_channels, hidden_channels, bottleneck_channels)
    ref = reference_forward(z, params, in_channels, hidden_channels)

    # ---- f32, collapsed-N fast path: exact vs reference.
    prep_f32 = prepare_params(params, in_channels=in_channels,
                              hidden_channels=hidden_channels)
    out = cde_func_forward(z, prep_f32,
                           in_channels=in_channels,
                           hidden_channels=hidden_channels)
    out = jax.block_until_ready(out)
    assert out.shape == (batch, seq, hidden_channels, in_channels), out.shape
    assert jnp.allclose(out, ref, atol=1e-5, rtol=1e-5), \
        float(jnp.max(jnp.abs(out - ref)))

    # ---- bf16 MXU path (all generations), bf16 tanh; f32 accumulation.
    prep_bf16 = prepare_params(params, in_channels=in_channels,
                               hidden_channels=hidden_channels,
                               compute_dtype=jnp.bfloat16)
    out_bf16 = cde_func_forward(z, prep_bf16,
                                in_channels=in_channels,
                                hidden_channels=hidden_channels,
                                compute_dtype=jnp.bfloat16)
    out_bf16 = jax.block_until_ready(out_bf16)
    assert out_bf16.shape == (batch, seq, hidden_channels, in_channels)
    assert jnp.allclose(out_bf16, ref, atol=5e-2, rtol=5e-2), \
        float(jnp.max(jnp.abs(out_bf16 - ref)))

    # ---- Tiled (large-out_dim) fallback path, forced at small shapes to
    #      validate the h2-scratch kernel end-to-end.
    in2, hid2 = 8, 64
    params2 = init_params(jax.random.PRNGKey(1), in2, hid2,
                          bottleneck_channels)
    z2 = jax.random.normal(jax.random.PRNGKey(2), (batch, seq, hid2),
                           dtype=jnp.float32)
    ref2 = reference_forward(z2, params2, in2, hid2)
    prep2 = prepare_params(params2, in_channels=in2, hidden_channels=hid2)
    out2 = cde_func_forward(z2, prep2, in_channels=in2, hidden_channels=hid2,
                            tn=128, force_tiled=True)
    out2 = jax.block_until_ready(out2)
    assert out2.shape == (batch, seq, hid2, in2), out2.shape
    assert jnp.allclose(out2, ref2, atol=1e-5, rtol=1e-5), \
        float(jnp.max(jnp.abs(out2 - ref2)))

    print("KERNEL_OK")
</pallas_src>

<mosaic_0001>
module attributes {stable_mosaic.version = 11 : i64} {
  func.func @_cde_kernel_full(%arg0: i32, %arg1: memref<8x32xf32, #tpu.memory_space<vmem>>, %arg2: memref<32x128xf32, #tpu.memory_space<vmem>>, %arg3: memref<1x128xf32, #tpu.memory_space<vmem>>, %arg4: memref<128x128xf32, #tpu.memory_space<vmem>>, %arg5: memref<1x128xf32, #tpu.memory_space<vmem>>, %arg6: memref<128x128xf32, #tpu.memory_space<vmem>>, %arg7: memref<1x128xf32, #tpu.memory_space<vmem>>, %arg8: memref<8x128xf32, #tpu.memory_space<vmem>>) attributes {dimension_semantics = [#tpu.dimension_semantics<parallel>], iteration_bounds = array<i64: 2>, scalar_prefetch = 0 : i64, scratch_operands = 0 : i64, tpu.core_type = #tpu.core_type<tc>, window_params = [{transform_indices = @transform_0, window_bounds = array<i64: 8, 32>}, {pipeline_mode = #tpu.pipeline_mode<synchronous>, transform_indices = @transform_1, window_bounds = array<i64: 32, 128>}, {pipeline_mode = #tpu.pipeline_mode<synchronous>, transform_indices = @transform_2, window_bounds = array<i64: 1, 128>}, {pipeline_mode = #tpu.pipeline_mode<synchronous>, transform_indices = @transform_3, window_bounds = array<i64: 128, 128>}, {pipeline_mode = #tpu.pipeline_mode<synchronous>, transform_indices = @transform_4, window_bounds = array<i64: 1, 128>}, {pipeline_mode = #tpu.pipeline_mode<synchronous>, transform_indices = @transform_5, window_bounds = array<i64: 128, 128>}, {pipeline_mode = #tpu.pipeline_mode<synchronous>, transform_indices = @transform_6, window_bounds = array<i64: 1, 128>}, {transform_indices = @transform_7, window_bounds = array<i64: 8, 128>}]} {
    %c0 = arith.constant 0 : index
    %c0_0 = arith.constant 0 : index
    %0 = vector.load %arg1[%c0, %c0_0] : memref<8x32xf32, #tpu.memory_space<vmem>>, vector<8x32xf32>
    %c0_1 = arith.constant 0 : index
    %c0_2 = arith.constant 0 : index
    %1 = vector.load %arg2[%c0_1, %c0_2] : memref<32x128xf32, #tpu.memory_space<vmem>>, vector<32x128xf32>
    %cst = arith.constant dense<0.000000e+00> : vector<8x128xf32>
    %2 = tpu.matmul %0, %1, %cst {dimension_numbers = #tpu.dot_dimension_numbers<[1], [0], [0], [1], [0, 0, 1, 1], [], []>} : vector<8x32xf32>, vector<32x128xf32>, vector<8x128xf32> -> vector<8x128xf32>
    %c0_3 = arith.constant 0 : index
    %c0_4 = arith.constant 0 : index
    %3 = vector.load %arg3[%c0_3, %c0_4] : memref<1x128xf32, #tpu.memory_space<vmem>>, vector<1x128xf32>
    %4 = vector.broadcast %3 : vector<1x128xf32> to vector<8x128xf32>
    %5 = arith.addf %2, %4 : vector<8x128xf32>
    %cst_5 = arith.constant 0.000000e+00 : f32
    %6 = vector.broadcast %cst_5 : f32 to vector<8x128xf32>
    %7 = arith.maximumf %5, %6 : vector<8x128xf32>
    %c0_6 = arith.constant 0 : index
    %c0_7 = arith.constant 0 : index
    %8 = vector.load %arg4[%c0_6, %c0_7] : memref<128x128xf32, #tpu.memory_space<vmem>>, vector<128x128xf32>
    %cst_8 = arith.constant dense<0.000000e+00> : vector<8x128xf32>
    %9 = tpu.matmul %7, %8, %cst_8 {dimension_numbers = #tpu.dot_dimension_numbers<[1], [0], [0], [1], [0, 0, 1, 1], [], []>} : vector<8x128xf32>, vector<128x128xf32>, vector<8x128xf32> -> vector<8x128xf32>
    %c0_9 = arith.constant 0 : index
    %c0_10 = arith.constant 0 : index
    %10 = vector.load %arg5[%c0_9, %c0_10] : memref<1x128xf32, #tpu.memory_space<vmem>>, vector<1x128xf32>
    %11 = vector.broadcast %10 : vector<1x128xf32> to vector<8x128xf32>
    %12 = arith.addf %9, %11 : vector<8x128xf32>
    %cst_11 = arith.constant 0.000000e+00 : f32
    %13 = vector.broadcast %cst_11 : f32 to vector<8x128xf32>
    %14 = arith.maximumf %12, %13 : vector<8x128xf32>
    %c0_12 = arith.constant 0 : index
    %c0_13 = arith.constant 0 : index
    %15 = vector.load %arg6[%c0_12, %c0_13] : memref<128x128xf32, #tpu.memory_space<vmem>>, vector<128x128xf32>
    %cst_14 = arith.constant dense<0.000000e+00> : vector<8x128xf32>
    %16 = tpu.matmul %14, %15, %cst_14 {dimension_numbers = #tpu.dot_dimension_numbers<[1], [0], [0], [1], [0, 0, 1, 1], [], []>} : vector<8x128xf32>, vector<128x128xf32>, vector<8x128xf32> -> vector<8x128xf32>
    %c0_15 = arith.constant 0 : index
    %c0_16 = arith.constant 0 : index
    %17 = vector.load %arg7[%c0_15, %c0_16] : memref<1x128xf32, #tpu.memory_space<vmem>>, vector<1x128xf32>
    %18 = vector.broadcast %17 : vector<1x128xf32> to vector<8x128xf32>
    %19 = arith.addf %16, %18 : vector<8x128xf32>
    %20 = math.tanh %19 : vector<8x128xf32>
    %c0_17 = arith.constant 0 : index
    %c0_18 = arith.constant 0 : index
    %21 = vector.load %arg8[%c0_17, %c0_18] : memref<8x128xf32, #tpu.memory_space<vmem>>, vector<8x128xf32>
    tpu.vector_store %arg8[%c0_17, %c0_18], %20 {strides = array<i32>} : memref<8x128xf32, #tpu.memory_space<vmem>>, vector<8x128xf32>,
    return
  }
  func.func @transform_0(%arg0: i32) -> (i32, i32) {
    %c0_i32 = arith.constant 0 : i32
    %c0_i32_0 = arith.constant 0 : i32
    return %arg0, %c0_i32 : i32, i32
  }
  func.func @transform_1(%arg0: i32) -> (i32, i32) {
    %c0_i32 = arith.constant 0 : i32
    %c0_i32_0 = arith.constant 0 : i32
    %c0_i32_1 = arith.constant 0 : i32
    return %c0_i32, %c0_i32_0 : i32, i32
  }
  func.func @transform_2(%arg0: i32) -> (i32, i32) {
    %c0_i32 = arith.constant 0 : i32
    %c0_i32_0 = arith.constant 0 : i32
    %c0_i32_1 = arith.constant 0 : i32
    return %c0_i32, %c0_i32_0 : i32, i32
  }
  func.func @transform_3(%arg0: i32) -> (i32, i32) {
    %c0_i32 = arith.constant 0 : i32
    %c0_i32_0 = arith.constant 0 : i32
    %c0_i32_1 = arith.constant 0 : i32
    return %c0_i32, %c0_i32_0 : i32, i32
  }
  func.func @transform_4(%arg0: i32) -> (i32, i32) {
    %c0_i32 = arith.constant 0 : i32
    %c0_i32_0 = arith.constant 0 : i32
    %c0_i32_1 = arith.constant 0 : i32
    return %c0_i32, %c0_i32_0 : i32, i32
  }
  func.func @transform_5(%arg0: i32) -> (i32, i32) {
    %c0_i32 = arith.constant 0 : i32
    %c0_i32_0 = arith.constant 0 : i32
    %c0_i32_1 = arith.constant 0 : i32
    return %c0_i32, %c0_i32_0 : i32, i32
  }
  func.func @transform_6(%arg0: i32) -> (i32, i32) {
    %c0_i32 = arith.constant 0 : i32
    %c0_i32_0 = arith.constant 0 : i32
    %c0_i32_1 = arith.constant 0 : i32
    return %c0_i32, %c0_i32_0 : i32, i32
  }
  func.func @transform_7(%arg0: i32) -> (i32, i32) {
    %c0_i32 = arith.constant 0 : i32
    %c0_i32_0 = arith.constant 0 : i32
    return %arg0, %c0_i32 : i32, i32
  }
}

</mosaic_0001>

<bundles_post_ra>
// kernel: cde_func_forward.1
= control target key start
LH: loop header
LB: loop body
LE: loop exit
PB: predicated region body
PF: predicated region fallthrough
CT: control target
= control target key end

     0   :  { %12 = vsyncpa [#allocation3], 0  ;;  %s995_s0 = inlined_call_operand.hbm [shape: f32[16,32], index: 0, kind: input, shape index: {}]   ;;  %s996_s1 = inlined_call_operand.hbm [shape: f32[32,128], index: 1, kind: input, shape index: {}]   ;;  %s997_s2 = inlined_call_operand.vmem [shape: f32[1,128], index: 2, kind: input, shape index: {}]   ;;  %s998_s3 = inlined_call_operand.hbm [shape: f32[128,128], index: 3, kind: input, shape index: {}]   ;;  %s999_s4 = inlined_call_operand.vmem [shape: f32[1,128], index: 4, kind: input, shape index: {}]   ;;  %s1000_s5 = inlined_call_operand.hbm [shape: f32[128,128], index: 5, kind: input, shape index: {}]   ;;  %s1001_s6 = inlined_call_operand.vmem [shape: f32[1,128], index: 6, kind: input, shape index: {}]   ;;  %s1002_s7 = inlined_call_operand.vmem [shape: f32[16,128], index: 7, kind: output, shape index: {}]  }
   0x1   :  { %14 = vsyncpa [#allocation3 + $0x1], 0 }
   0x2   :  { %15 = vsyncpa [#allocation5], 0 }
   0x3   :  { %16 = vsyncpa [#allocation8], 0  ;;  %s860_s24 = smov 0   ;;  %s862_s25 = smov 0  }
   0x4   :  { %s864_s26 = smov 0   ;;  %s866_s27 = smov 0  }
   0x5 LB: > { %s216_s30 = sshll.u32 %s996_s1, 4  ;;  %s884_s8 = sadd.s32 4294967295, %s813_s27   ;;  %s813_s27 = sphi %s866_s27, %s1010_s27   ;;  %s809_s26 = sphi %s864_s26, %s1009_s26   ;;  %s805_s25 = sphi %s862_s25, %s1008_s25   ;;  %s801_s24 = sphi %s860_s24, %s1007_s24   ;;  %s217_s30 = int_to_ptr.hbm [resolvable:$true] %s216_s30 }
   0x6   : > { %p558_p0 = scmp.ge.s32.totalorder %s813_s27, 1  ;;  %p43_p1 = scmp.eq.s32.totalorder %s884_s8, 0 }
   0x7   : > { %p205_p2 = scmp.lt.s32.totalorder %s813_s27, 3  ;;  %s815_s10 = smov [#allocation4]  }
   0x8   : > { %s218_s11 = sshll.u32 %s815_s10, 4  ;;  %s233_s14 = sshll.u32 %s998_s3, 4  ;;  %s219_s11 = int_to_ptr.vmem [resolvable:$true] %s218_s11  ;;  %s234_s14 = int_to_ptr.hbm [resolvable:$true] %s233_s14 }
   0x9   : > { %p889_p3 = pnand %p558_p0, %p205_p2  ;;  %s250_s18 = sshll.u32 %s1000_s5, 4  ;;  %s251_s18 = int_to_ptr.hbm [resolvable:$true] %s250_s18 }
   0xa   : > { %s816_s19 = smov [#allocation6]   ;;  %s817_s21 = smov 128  }
   0xb   : > { %p588_p4 = pneg %p889_p3  ;;  %s235_s20 = sshll.u32 %s816_s19, 4  ;;  %s236_s20 = int_to_ptr.vmem [resolvable:$true] %s235_s20 }
   0xc   : > { %s818_s22 = smov 8   ;;  %s819_s23 = smov [#allocation7]  }
   0xd   : > { %p900_p5 = pnand %p588_p4, %p43_p1  ;;  %s252_s28 = sshll.u32 %s819_s23, 4  ;;  %s253_s28 = int_to_ptr.vmem [resolvable:$true] %s252_s28 }
   0xe   : > { %s914_s29 = sadd.s32 1, %s813_s27   ;;  %s29_s12 = sadd.s32 1, %s809_s26 }
   0xf   : > { %591 = dma.hbm_to_vmem [thread:$0]  (!%p900_p5), %s217_s30, 512, %s219_s11, [#allocation5], %s817_s21, %s817_s21, %s818_s22  }
  0x10   : > { %594 = dma.hbm_to_vmem [thread:$0]  (!%p900_p5), %s234_s14, 2048, %s236_s20, [#allocation5], %s817_s21, %s817_s21, %s818_s22  }
  0x11   : > { %597 = dma.hbm_to_vmem [thread:$0]  (!%p900_p5), %s251_s18, 2048, %s253_s28, [#allocation8], %s817_s21, %s817_s21, %s818_s22  }
  0x12   : > { %s26_s10 = ssub.s32 %s813_s27, %s914_s29  ;;  %p36_p7 = scmp.ne.s32.totalorder %s809_s26, %s805_s25 }
  0x13   : > { %p27_p6 = scmp.eq.s32.totalorder %s26_s10, 0  ;;  %p37_p8 = scmp.eq.s32.totalorder %s813_s27, 0 }
  0x14   : > { %p42_p9 = scmp.ne.s32.totalorder %s805_s25, %s801_s24  ;;  %p605_p12 = scmp.lt.s32.totalorder %s813_s27, 2 }
  0x15   : > { %s925_s30 = scalar_select %p27_p6, %s809_s26, %s29_s12  }
  0x16   : > { %p38_p10 = por %p37_p8, %p36_p7  ;;  %p929_p11 = por %p43_p1, %p42_p9 }
  0x17   : > { %s269_s13 = sand.u32 1, %s809_s26   ;;  %s564_s15 = sshll.u32 %s813_s27, 3 }
  0x18   : > { %s563_s14 = sshll.u32 %s269_s13, 3  ;;  %s277_s18 = scalar_lea.hbm %s995_s0, %s564_s15 }
  0x19   : > { %s273_s19 = scalar_lea.vmem [#allocation2], %s563_s14  ;;  %s279_s21 = sshll.u32 %s277_s18, 4  ;;  %s280_s21 = int_to_ptr.hbm [resolvable:$true] %s279_s21 }
  0x1a   : > { %s281_s20 = sshll.u32 %s273_s19, 4  ;;  %p939_p13 = pnand %p605_p12, %p38_p10  ;;  %s282_s20 = int_to_ptr.vmem [resolvable:$true] %s281_s20 }
  0x1b   : > { %s270_s22 = scalar_lea.sflag [#allocation3], %s269_s13  ;;  %s741_s23 = sshra.s32 %s280_s21, 4  ;;  %s742_s23 = int_to_ptr.hbm [resolvable:$true] %s741_s23 }
  0x1c   : > { %s743_s28 = scalar_lea.hbm %s742_s23, 8  ;;  %p745_p2 = pneg %p939_p13 }
  0x1d   : > { %p744_p0 = scmp.ne.s32.totalorder %s742_s23, %s743_s28  ;;  %s748_s12 = scalar_lea.hbm %s995_s0, 16 }
  0x1e   : > { %p749_p6 = scmp.lt.s32.totalorder %s742_s23, %s995_s0  ;;  %p750_p7 = scmp.lt.s32.totalorder %s748_s12, %s743_s28 }
  0x1f   : > { %p746_p4 = pnand %p745_p2, %p744_p0 }
  0x20   : > { %p751_p8 = por %p750_p7, %p749_p6 }
  0x21   : > { %p747_p5 = pneg %p746_p4 }
  0x23   : > { %p752_p9 = pnand %p751_p8, %p747_p5 }
  0x25   : > { %755 = shalt.err (!%p752_p9)
}
  0x26   : > { %601 = dma.hbm_to_vmem [thread:$0]  (!%p939_p13), %s280_s21, 128, %s282_s20, %s270_s22  }
  0x27   : > { %290 = sbr.rel (%p889_p3) target bundleno = 459 (0x1cb), region = 48  ;;  %s292_s13 = sand.u32 (!%p889_p3), 1, %s805_s25  }
  0x28   : > { %s566_s16 = sshll.u32 (!%p889_p3), %s292_s13, 3  ;;  %s293_s17 = scalar_lea.sflag (!%p889_p3), [#allocation3], %s292_s13 }
  0x29   : > { %s296_s18 = scalar_lea.vmem (!%p889_p3), [#allocation2], %s566_s16 }
  0x2c   : > { %788 = dma.done.wait (%p929_p11), %s293_s17, 128  }
  0x2d   : > { %790 = vsyncadd (%p929_p11), %s293_s17, 4294967168 }
  0x2e   : > { %792 = dma.done.wait (%p43_p1), [#allocation5], 2560  }
  0x2f   : > { %794 = vsyncadd (%p43_p1), [#allocation5], 4294964736 }
  0x30   : > { %796 = dma.done.wait (%p43_p1), [#allocation8], 2048  }
  0x31   : > { %798 = vsyncadd (%p43_p1), [#allocation8], 4294965248  ;;  %v350_v0 = vld [vmem:[#allocation4 + $0x18] sm:$0xff]  ;;  %v349_v1 = vld [vmem:[#allocation4 + $0x10] sm:$0xff]  ;;  %vm355_vm0 = vcmask 261120   ;;  %p342_p1 = scmp.lt.s32.totalorder %s884_s8, 1 }
  0x32   : > { %371 = vmatpush.msra.mxu0 %v350_v0  ;;  %v395_v2 = vld [vmem:[#allocation6 + $0x78] sm:$0xff]  ;;  %v348_v3 = vld [vmem:[#allocation4 + $0x8] sm:$0xff]  ;;  %v394_v4 = vld [vmem:[#allocation6 + $0x70] sm:$0xff] }
  0x33   : > { %400 = vmatpush.msra.mxu1 %v395_v2  ;;  %v393_v5 = vld [vmem:[#allocation6 + $0x68] sm:$0xff]  ;;  %v347_v6 = vld [vmem:[#allocation4] sm:$0xff]  ;;  %v346_v7 = vld [vmem:[%s296_s18] sm:$0xff]  ;;  %s1012_s8 = smov (!%p342_p1, %s884_s8), 1 }
  0x34   : > { %372 = vmatpush.msra.mxu0 %v349_v1  ;;  %v392_v8 = vld [vmem:[#allocation6 + $0x60] sm:$0xff]  ;;  %v391_v9 = vld [vmem:[#allocation6 + $0x58] sm:$0xff]  ;;  %v390_v10 = vld [vmem:[#allocation6 + $0x50] sm:$0xff]  ;;  %s570_s22 = sshll.u32 %s1012_s8, 3 }
  0x35   : > { %401 = vmatpush.msra.mxu1 %v394_v4  ;;  %v389_v11 = vld [vmem:[#allocation6 + $0x48] sm:$0xff]  ;;  %v388_v12 = vld [vmem:[#allocation6 + $0x40] sm:$0xff]  ;;  %v387_v13 = vld [vmem:[#allocation6 + $0x38] sm:$0xff]  ;;  %s345_s27 = scalar_lea.vmem %s1002_s7, %s570_s22 }
  0x36   : > { %373 = vmatpush.msra.mxu0 %v348_v3  ;;  %v386_v14 = vld [vmem:[#allocation6 + $0x30] sm:$0xff]  ;;  %v385_v15 = vld [vmem:[#allocation6 + $0x28] sm:$0xff]  ;;  %v384_v16 = vld [vmem:[#allocation6 + $0x20] sm:$0xff] }
  0x37   : > { %402 = vmatpush.msra.mxu1 %v393_v5  ;;  %v383_v17 = vld [vmem:[#allocation6 + $0x18] sm:$0xff]  ;;  %v382_v18 = vld [vmem:[#allocation6 + $0x10] sm:$0xff]  ;;  %v381_v19 = vld [vmem:[#allocation6 + $0x8] sm:$0xff] }
  0x38   : > { %374 = vmatpush.msra.mxu0 %v347_v6  ;;  %v380_v20 = vld [vmem:[#allocation6] sm:$0xff]  ;;  %v436_v21 = vld [vmem:[#allocation7 + $0x78] sm:$0xff]  ;;  %v435_v22 = vld [vmem:[#allocation7 + $0x70] sm:$0xff] }
  0x39   : > { %571 = vmatmul.msk.f32.vlgmr.msra.gmra.mxu0 %vm355_vm0, %v346_v7  ;;  %403 = vmatpush.msra.mxu1 %v392_v8  ;;  %v434_v23 = vld [vmem:[#allocation7 + $0x68] sm:$0xff]  ;;  %v433_v24 = vld [vmem:[#allocation7 + $0x60] sm:$0xff]  ;;  %v432_v25 = vld [vmem:[#allocation7 + $0x58] sm:$0xff] }
  0x3a   : > { %441 = vmatpush.msra.mxu2 %v436_v21  ;;  %v431_v26 = vld [vmem:[#allocation7 + $0x50] sm:$0xff]  ;;  %v430_v27 = vld [vmem:[#allocation7 + $0x48] sm:$0xff]  ;;  %v429_v28 = vld [vmem:[#allocation7 + $0x40] sm:$0xff] }
  0x3b   : > { %404 = vmatpush.msra.mxu1 %v391_v9  ;;  %v428_v29 = vld [vmem:[#allocation7 + $0x38] sm:$0xff]  ;;  %v427_v30 = vld [vmem:[#allocation7 + $0x30] sm:$0xff]  ;;  %v426_v31 = vld [vmem:[#allocation7 + $0x28] sm:$0xff] }
  0x3c   : > { %442 = vmatpush.msra.mxu2 %v435_v22  ;;  %v425_v32 = vld [vmem:[#allocation7 + $0x20] sm:$0xff]  ;;  %v424_v33 = vld [vmem:[#allocation7 + $0x18] sm:$0xff]  ;;  %v646_v34 = vld [vmem:[%s997_s2] ss:$0 sm:$0xff] }
  0x3d   : > { %405 = vmatpush.msra.mxu1 %v390_v10  ;;  %v423_v38 = vld [vmem:[#allocation7 + $0x10] sm:$0xff]  ;;  %v422_v39 = vld [vmem:[#allocation7 + $0x8] sm:$0xff]  ;;  %v421_v40 = vld [vmem:[#allocation7] sm:$0xff] }
  0x3e   : > { %443 = vmatpush.msra.mxu2 %v434_v23  ;;  %v647_v41 = vld [vmem:[%s999_s4] ss:$0 sm:$0xff] }
  0x3f   : > { %406 = vmatpush.msra.mxu1 %v389_v11  ;;  %v648_v45 = vld [vmem:[%s1001_s6] ss:$0 sm:$0xff] }
  0x40   : > { %444 = vmatpush.msra.mxu2 %v433_v24 }
  0x41   : > { %407 = vmatpush.msra.mxu1 %v388_v12 }
  0x42   : > { %445 = vmatpush.msra.mxu2 %v432_v25 }
  0x43   : > { %408 = vmatpush.msra.mxu1 %v387_v13 }
  0x44   : > { %446 = vmatpush.msra.mxu2 %v431_v26 }
  0x45   : > { %409 = vmatpush.msra.mxu1 %v386_v14 }
  0x46   : > { %447 = vmatpush.msra.mxu2 %v430_v27 }
  0x47   : > { %410 = vmatpush.msra.mxu1 %v385_v15 }
  0x48   : > { %448 = vmatpush.msra.mxu2 %v429_v28 }
  0x49   : > { %411 = vmatpush.msra.mxu1 %v384_v16 }
  0x4a   : > { %449 = vmatpush.msra.mxu2 %v428_v29 }
  0x4b   : > { %412 = vmatpush.msra.mxu1 %v383_v17 }
  0x4c   : > { %450 = vmatpush.msra.mxu2 %v427_v30 }
  0x4d   : > { %413 = vmatpush.msra.mxu1 %v382_v18 }
  0x4e   : > { %451 = vmatpush.msra.mxu2 %v426_v31 }
  0x4f   : > { %414 = vmatpush.msra.mxu1 %v381_v19 }
  0x50   : > { %452 = vmatpush.msra.mxu2 %v425_v32 }
  0x51   : > { %415 = vmatpush.msra.mxu1 %v380_v20 }
  0x52   : > { %453 = vmatpush.msra.mxu2 %v424_v33 }
  0x54   : > { %454 = vmatpush.msra.mxu2 %v423_v38 }
  0x56   : > { %455 = vmatpush.msra.mxu2 %v422_v39 }
  0x58   : > { %456 = vmatpush.msra.mxu2 %v421_v40 }
  0xb6   : > { %v376_v35 = vpop.f32.mrf.mxu0 }
  0xb7   : > { %v377_v36 = vadd.f32 %v646_v34, %v376_v35 }
  0xb9   : > { %v379_v37 = vmax.f32 %v377_v36, 0.0 }
  0xbb   : > { %416 = vmatmul.f32.vlgmr.msra.gmra.mxu1 %v379_v37 }
 0x138   : > { %v417_v42 = vpop.f32.mrf.mxu1 }
 0x139   : > { %v418_v43 = vadd.f32 %v647_v41, %v417_v42 }
 0x13b   : > { %v420_v44 = vmax.f32 %v418_v43, 0.0 }
 0x13d   : > { %457 = vmatmul.f32.vlgmr.msra.gmra.mxu2 %v420_v44 }
 0x1c0   : > { %v458_v46 = vpop.f32.mrf.mxu2 }
 0x1c1   : > { %v459_v47 = vadd.f32 %v648_v45, %v458_v46 }
 0x1c3   : > { %649 = vtanh.f32 %v459_v47 }
 0x1c9   : > { %v650_v48 = vpop.eup %649 }
 0x1ca   : > { %462 = vst [vmem:[%s345_s27] sm:$0xff] %v650_v48 }
 0x1cb PF: > { %p19_p3 = scmp.ge.s32.totalorder %s914_s29, 4   ;;  %s1007_s24 = smov %s805_s25 }
 0x1cc   : > { %s1008_s25 = smov %s809_s26  ;;  %s1009_s26 = smov %s925_s30 }
 0x1cd   : > { %s1010_s27 = smov %s914_s29  ;;  %21 = sbr.rel (!%p19_p3) target bundleno = 5 (0x5), region = 100 }
 0x1d2   :  { %482 = vsyncpa [#allocation3], 1 }
 0x1d3   :  { %484 = vsyncpa [#allocation3 + $0x1], 1 }
 0x1d4   :  { %485 = vsyncpa [#allocation5], 1 }
 0x1d5   :  { %486 = vsyncpa [#allocation8], 1 }

</bundles_post_ra>
